<compile_context>
chip_gen: v7x
topology: tpu7x:2x2x1
jax: 0.10.0
libtpu: 0.0.40
codegen_flags: <defaults>
</compile_context>

<pallas_src>
import functools

import jax
import jax.numpy as jnp
from jax.experimental import pallas as pl
from jax.experimental.pallas import tpu as pltpu


def _round_up(v, m):
    return (v + m - 1) // m * m


def _vmem_capacity_bytes():
    try:
        return int(pltpu.get_tpu_info().vmem_capacity_bytes)
    except Exception:
        return 64 << 20          # conservative default (v7x: 64 MiB per TC)


def _bf16_eup_ok():
    # bf16 tanh only on v6e / v7x EUPs; keep f32 tanh elsewhere (v5e, v4, ...).
    try:
        kind = jax.devices()[0].device_kind.lower()
    except Exception:
        return False
    return ("v6" in kind) or ("v7" in kind)


def _pick_tile_m(n, dim_x, dim_h_pad, diag, budget, max_tile=None):
    """Largest batch tile (multiple of 128, or the whole padded batch when it
    is small) whose working set fits the VMEM budget, accounting for the
    resident double-buffered bf16 B matrix in the diagnostic path."""
    n8 = _round_up(max(n, 1), 8)
    per_row = 4 * dim_x * 2          # x tile, f32, double buffered
    per_row += 4 * dim_x             # z = x*(b-0.5x)
    per_row += 4 * 8                 # (8, tm) NT-matmul result
    per_row += 4 * 8 * 2             # unden out block (padded to 8 sublanes)
    if diag:
        per_row += 2 * dim_x         # bf16 copy of x
        per_row += 8 * dim_h_pad     # xBc/2 (f32) + tanh temp
    fixed = 2 * 4 * 8 * _round_up(dim_x, 128)        # b row (padded, dbl-buf)
    if diag:
        fixed += 2 * 2 * dim_x * dim_h_pad           # bf16 B, double buffered
        fixed += 2 * 4 * 8 * dim_h_pad               # c row
    avail = budget - fixed - (2 << 20)
    tm = avail // max(per_row, 1)
    tm = int(max(128, min(2048, (tm // 128) * 128)))
    if max_tile is not None:
        tm = max(128, min(tm, int(max_tile)))
    if n8 <= tm:
        return n8, n8
    return tm, _round_up(n, tm)


def _vmem_limit_bytes(tm, dim_x, dim_h_pad, diag, capacity):
    need = 2 * 4 * tm * dim_x                              # x (double buffered)
    need += 2 * 4 * 8 * _round_up(dim_x, 128)              # b row
    need += 2 * 4 * 8 * _round_up(tm, 128)                 # unden out blocks
    need += 4 * tm * dim_x + 4 * 8 * _round_up(tm, 128)    # z + NT result
    if diag:
        need += 2 * 2 * dim_x * dim_h_pad                  # bf16 B (dbl buf)
        need += 2 * 4 * 8 * dim_h_pad                      # c row
        need += 2 * tm * dim_x                             # bf16 x
        need += 2 * 4 * tm * dim_h_pad                     # xBc/2 + tanh temp
        need += 2 * 4 * 8 * 128                            # diff out blocks
    need += 4 << 20                                        # headroom / misc
    cap = min(int(capacity) * 3 // 4, 100 << 20)
    return int(min(max(need, 8 << 20), cap))


def _rbm_kernel(x_ref, b_ref, *rest, n_valid, compute_diag, mask_rows,
                tanh_bf16):
    if compute_diag:
        B_ref, c_ref, unden_ref, diff_ref = rest
    else:
        (unden_ref,) = rest

    x = x_ref[...]                                   # (tm, dim_x) f32
    tm, dim_x = x.shape

    # unden[j] = sum_k x[j,k]*(b[k] - 0.5*x[j,k]).  Deliver it as a lane-dense
    # (1, tm) row via a small NT matmul (contraction over dim_x on the MXU),
    # so the output store is a full-lane vst instead of a (tm,1) column of
    # masked partial stores.  HIGHEST precision keeps unden at f32 accuracy.
    z = x * (b_ref[...] - 0.5 * x)                   # (tm, dim_x)   VPU
    ones = jnp.ones((8, dim_x), jnp.float32)
    row = jax.lax.dot_general(
        ones, z, (((1,), (1,)), ((), ())),
        precision=jax.lax.Precision.HIGHEST,
        preferred_element_type=jnp.float32)          # (8, tm); rows identical
    unden_ref[0] = row[0:1, :]                       # (1, tm)

    if compute_diag:
        # m = x @ (B/4) + c/2 == (0.5*x@B + c)/2 ; padded columns of B/c are
        # exactly zero so tanh(0)=0 contributes nothing to the sums.
        m = jnp.dot(x.astype(jnp.bfloat16), B_ref[...],
                    preferred_element_type=jnp.float32) + c_ref[...]
        t = jnp.tanh(m.astype(jnp.bfloat16) if tanh_bf16 else m)
        tot_rows = jnp.sum(t.astype(jnp.float32), axis=1, keepdims=True)  # (tm,1)
        if mask_rows:
            rows = (pl.program_id(0) * tm
                    + jax.lax.broadcasted_iota(jnp.int32, (tm, 1), 0))
            tot_rows = jnp.where(rows < n_valid, tot_rows, 0.0)
        # Per-tile partial of sum(unden - unden2) = -sum_{rows,h} tanh(...).
        diff_ref[0] = -jnp.sum(tot_rows, axis=0, keepdims=True)          # (1,1)


@functools.partial(jax.jit, static_argnames=("compute_diag", "max_tile"))
def _rbm_forward_impl(x, B, b, c, *, compute_diag=True, max_tile=None):
    x = x.astype(jnp.float32)
    n, dim_x = x.shape
    dim_h = B.shape[1]
    dim_h_pad = _round_up(dim_h, 128)

    capacity = _vmem_capacity_bytes()
    budget = min(capacity // 2, 56 << 20)      # ~32 MiB on v7x, 56 MiB v5e/v6e

    tm, n_pad = _pick_tile_m(n, dim_x, dim_h_pad, compute_diag, budget,
                             max_tile)
    if n_pad != n:
        x = jnp.pad(x, ((0, n_pad - n), (0, 0)))
    grid_m = n_pad // tm
    mask_rows = n_pad != n

    b_row = b.astype(jnp.float32).reshape(1, dim_x)

    inputs = [x, b_row]
    in_specs = [
        pl.BlockSpec((tm, dim_x), lambda i: (i, 0)),        # x tile (pipelined)
        pl.BlockSpec((1, dim_x), lambda i: (0, 0)),         # b row (resident)
    ]
    out_shape = [jax.ShapeDtypeStruct((grid_m, 1, tm), jnp.float32)]
    out_specs = [pl.BlockSpec((1, 1, tm), lambda i: (i, 0, 0))]

    tanh_bf16 = False
    if compute_diag:
        tanh_bf16 = _bf16_eup_ok()
        # Fold the 0.5 matmul scale and the /2 inside tanh(xBc/2) into the
        # weights: kernel computes tanh(x @ (B/4) + c/2) directly, in bf16.
        Bq = jnp.zeros((dim_x, dim_h_pad), jnp.bfloat16)
        Bq = Bq.at[:, :dim_h].set(
            (0.25 * B.astype(jnp.float32)).astype(jnp.bfloat16))
        ch = jnp.zeros((1, dim_h_pad), jnp.float32)
        ch = ch.at[0, :dim_h].set(0.5 * c.astype(jnp.float32))
        inputs += [Bq, ch]
        in_specs += [
            pl.BlockSpec((dim_x, dim_h_pad), lambda i: (0, 0)),  # B (resident)
            pl.BlockSpec((1, dim_h_pad), lambda i: (0, 0)),      # c (resident)
        ]
        out_shape.append(jax.ShapeDtypeStruct((grid_m, 1, 1), jnp.float32))
        out_specs.append(pl.BlockSpec((1, 1, 1), lambda i: (i, 0, 0)))

    # TODO(synk): for extreme dim_x*dim_h (bf16 B above ~20 MiB) add a second
    # grid axis that tiles B into 128/256-wide column panels instead of
    # keeping it fully resident in VMEM.
    vmem_bytes = _vmem_limit_bytes(tm, dim_x, dim_h_pad, compute_diag, capacity)

    flops = (2 * 8 + 3) * n_pad * dim_x
    trans = 0
    bytes_acc = 4 * (n_pad * dim_x + dim_x + n_pad)
    if compute_diag:
        flops += 2 * n_pad * dim_x * dim_h_pad + 2 * n_pad * dim_h_pad
        trans = n_pad * dim_h_pad
        bytes_acc += 2 * dim_x * dim_h_pad + 4 * dim_h_pad + 4 * grid_m
    cost = pl.CostEstimate(flops=flops, transcendentals=trans,
                           bytes_accessed=bytes_acc)

    kernel = functools.partial(
        _rbm_kernel, n_valid=n, compute_diag=compute_diag,
        mask_rows=mask_rows, tanh_bf16=tanh_bf16)

    outs = pl.pallas_call(
        kernel,
        grid=(grid_m,),
        out_shape=tuple(out_shape),
        in_specs=in_specs,
        out_specs=tuple(out_specs),
        compiler_params=pltpu.CompilerParams(
            dimension_semantics=("parallel",),
            vmem_limit_bytes=vmem_bytes),
        cost_estimate=cost,
    )(*inputs)

    unden = outs[0].reshape(n_pad)[:n]
    if compute_diag:
        diff_mean = jnp.sum(outs[1]) / n
        return unden, diff_mean
    return unden, None


def rbm_forward(x, B, b, c, compute_diag=True):
    """Matches GaussianBernoulliRBM.forward: returns unden (N,) and prints the
    (unden - unden2).mean() diagnostic.  Use compute_diag=False in production
    to skip the B matmul / tanh pass entirely."""
    unden, diff_mean = _rbm_forward_impl(x, B, b, c, compute_diag=compute_diag)
    if compute_diag:
        # Mirrors the module's print(); host-side, outside the jit.
        print(float(diff_mean))
    return unden


def _reference(x, B, b, c):
    xBc = 0.5 * x @ B + c
    unden = (x * b).sum(1) - 0.5 * (x ** 2).sum(1)
    diff_mean = (-jnp.tanh(xBc / 2.0).sum(1)).mean()
    return unden, diff_mean


if __name__ == "__main__":
    key = jax.random.PRNGKey(0)
    k1, k2, k3, k4 = jax.random.split(key, 4)

    # Small shapes consistent with the module: x (N, dim_x), B (dim_x, dim_h).
    N, dim_x, dim_h = 8, 64, 32
    B = jax.random.normal(k1, (dim_x, dim_h), dtype=jnp.float32) * 0.1
    b = jax.random.normal(k2, (dim_x,), dtype=jnp.float32) * 0.1
    c = jax.random.normal(k3, (dim_h,), dtype=jnp.float32) * 0.1
    x = jax.random.normal(k4, (N, dim_x), dtype=jnp.float32)

    unden = rbm_forward(x, B, b, c)
    unden = jax.block_until_ready(unden)
    assert unden.shape == (N,), unden.shape

    ref_unden, ref_diff = _reference(x, B, b, c)
    assert jnp.allclose(unden, ref_unden, atol=1e-4, rtol=1e-4), (unden, ref_unden)

    # Scalar diagnostic path (bf16 matmul/tanh in-kernel -> loose tolerance;
    # the returned unden stays f32-accurate).
    u_d, d_d = _rbm_forward_impl(x, B, b, c, compute_diag=True)
    assert jnp.allclose(u_d, ref_unden, atol=1e-4, rtol=1e-4), (u_d, ref_unden)
    assert jnp.allclose(d_d, ref_diff, atol=5e-2, rtol=5e-2), (d_d, ref_diff)

    # Row padding + in-kernel row masking (N not a multiple of 8).
    N2 = 19
    x2 = jax.random.normal(jax.random.PRNGKey(1), (N2, dim_x), dtype=jnp.float32)
    u2, d2 = _rbm_forward_impl(x2, B, b, c, compute_diag=True)
    r_u2, r_d2 = _reference(x2, B, b, c)
    assert u2.shape == (N2,), u2.shape
    assert jnp.allclose(u2, r_u2, atol=1e-4, rtol=1e-4), (u2, r_u2)
    assert jnp.allclose(d2, r_d2, atol=5e-2, rtol=5e-2), (d2, r_d2)

    # Multi-tile grid with "parallel" batch axis + per-tile diff partials.
    N3 = 300
    x3 = jax.random.normal(jax.random.PRNGKey(2), (N3, dim_x), dtype=jnp.float32)
    u3, d3 = _rbm_forward_impl(x3, B, b, c, compute_diag=True, max_tile=128)
    r_u3, r_d3 = _reference(x3, B, b, c)
    assert u3.shape == (N3,), u3.shape
    assert jnp.allclose(u3, r_u3, atol=1e-4, rtol=1e-4), (u3, r_u3)
    assert jnp.allclose(d3, r_d3, atol=5e-2, rtol=5e-2), (d3, r_d3)

    # compute_diag=False fast path (no B matmul, no B DMA at all).
    u4, _ = _rbm_forward_impl(x, B, b, c, compute_diag=False)
    assert jnp.allclose(u4, ref_unden, atol=1e-4, rtol=1e-4), (u4, ref_unden)

    jax.block_until_ready((u_d, u2, u3, u4))
    print("KERNEL_OK")
</pallas_src>

<mosaic_0001>
module attributes {stable_mosaic.version = 11 : i64} {
  func.func @_rbm_kernel(%arg0: i32, %arg1: memref<8x64xf32, #tpu.memory_space<vmem>>, %arg2: memref<1x64xf32, #tpu.memory_space<vmem>>, %arg3: memref<64x128xbf16, #tpu.memory_space<vmem>>, %arg4: memref<1x128xf32, #tpu.memory_space<vmem>>, %arg5: memref<1x1x8xf32, #tpu.memory_space<vmem>>, %arg6: memref<1x1x1xf32, #tpu.memory_space<vmem>>) attributes {dimension_semantics = [#tpu.dimension_semantics<parallel>], iteration_bounds = array<i64: 1>, scalar_prefetch = 0 : i64, scratch_operands = 0 : i64, tpu.core_type = #tpu.core_type<tc>, window_params = [{transform_indices = @transform_0, window_bounds = array<i64: 8, 64>}, {pipeline_mode = #tpu.pipeline_mode<synchronous>, transform_indices = @transform_1, window_bounds = array<i64: 1, 64>}, {pipeline_mode = #tpu.pipeline_mode<synchronous>, transform_indices = @transform_2, window_bounds = array<i64: 64, 128>}, {pipeline_mode = #tpu.pipeline_mode<synchronous>, transform_indices = @transform_3, window_bounds = array<i64: 1, 128>}, {transform_indices = @transform_4, window_bounds = array<i64: 1, 1, 8>}, {transform_indices = @transform_5, window_bounds = array<i64: 1, 1, 1>}]} {
    %c0 = arith.constant 0 : index
    %c0_0 = arith.constant 0 : index
    %0 = vector.load %arg1[%c0, %c0_0] : memref<8x64xf32, #tpu.memory_space<vmem>>, vector<8x64xf32>
    %c0_1 = arith.constant 0 : index
    %c0_2 = arith.constant 0 : index
    %1 = vector.load %arg2[%c0_1, %c0_2] : memref<1x64xf32, #tpu.memory_space<vmem>>, vector<1x64xf32>
    %cst = arith.constant 5.000000e-01 : f32
    %2 = vector.broadcast %cst : f32 to vector<8x64xf32>
    %3 = arith.mulf %2, %0 : vector<8x64xf32>
    %4 = vector.broadcast %1 : vector<1x64xf32> to vector<8x64xf32>
    %5 = arith.subf %4, %3 : vector<8x64xf32>
    %6 = arith.mulf %0, %5 : vector<8x64xf32>
    %cst_3 = arith.constant 1.000000e+00 : f32
    %7 = vector.broadcast %cst_3 : f32 to vector<8x64xf32>
    %cst_4 = arith.constant dense<0.000000e+00> : vector<8x8xf32>
    %8 = tpu.matmul %7, %6, %cst_4 {dimension_numbers = #tpu.dot_dimension_numbers<[1], [1], [0], [0], [0, 0, 1, 0], [], []>, precision = #tpu.contract_precision<fp32>} : vector<8x64xf32>, vector<8x64xf32>, vector<8x8xf32> -> vector<8x8xf32>
    %9 = vector.extract_strided_slice %8 {offsets = [0, 0], sizes = [1, 8], strides = [1, 1]} : vector<8x8xf32> to vector<1x8xf32>
    %c0_5 = arith.constant 0 : index
    %c0_6 = arith.constant 0 : index
    %c0_7 = arith.constant 0 : index
    %10 = vector.load %arg5[%c0_5, %c0_6, %c0_7] : memref<1x1x8xf32, #tpu.memory_space<vmem>>, vector<1x1x8xf32>
    %11 = vector.shape_cast %10 : vector<1x1x8xf32> to vector<1x8xf32>
    %12 = vector.shape_cast %9 : vector<1x8xf32> to vector<1x1x8xf32>
    tpu.vector_store %arg5[%c0_5, %c0_6, %c0_7], %12 {strides = array<i32>} : memref<1x1x8xf32, #tpu.memory_space<vmem>>, vector<1x1x8xf32>,
    %13 = arith.truncf %0 : vector<8x64xf32> to vector<8x64xbf16>
    %c0_8 = arith.constant 0 : index
    %c0_9 = arith.constant 0 : index
    %14 = vector.load %arg3[%c0_8, %c0_9] : memref<64x128xbf16, #tpu.memory_space<vmem>>, vector<64x128xbf16>
    %cst_10 = arith.constant dense<0.000000e+00> : vector<8x128xf32>
    %15 = tpu.matmul %13, %14, %cst_10 {dimension_numbers = #tpu.dot_dimension_numbers<[1], [0], [0], [1], [0, 0, 1, 1], [], []>} : vector<8x64xbf16>, vector<64x128xbf16>, vector<8x128xf32> -> vector<8x128xf32>
    %c0_11 = arith.constant 0 : index
    %c0_12 = arith.constant 0 : index
    %16 = vector.load %arg4[%c0_11, %c0_12] : memref<1x128xf32, #tpu.memory_space<vmem>>, vector<1x128xf32>
    %17 = vector.broadcast %16 : vector<1x128xf32> to vector<8x128xf32>
    %18 = arith.addf %15, %17 : vector<8x128xf32>
    %19 = math.tanh %18 : vector<8x128xf32>
    %cst_13 = arith.constant dense<0.000000e+00> : vector<8xf32>
    %20 = vector.multi_reduction <add>, %19, %cst_13 [1] : vector<8x128xf32> to vector<8xf32>
    %21 = vector.shape_cast %20 : vector<8xf32> to vector<8x1xf32>
    %cst_14 = arith.constant dense<0.000000e+00> : vector<1xf32>
    %22 = vector.multi_reduction <add>, %21, %cst_14 [0] : vector<8x1xf32> to vector<1xf32>
    %23 = vector.shape_cast %22 : vector<1xf32> to vector<1x1xf32>
    %cst_15 = arith.constant 0.000000e+00 : f32
    %24 = vector.broadcast %cst_15 : f32 to vector<1x1xf32>
    %25 = arith.subf %24, %23 : vector<1x1xf32>
    %c0_16 = arith.constant 0 : index
    %c0_17 = arith.constant 0 : index
    %c0_18 = arith.constant 0 : index
    %26 = vector.load %arg6[%c0_16, %c0_17, %c0_18] : memref<1x1x1xf32, #tpu.memory_space<vmem>>, vector<1x1x1xf32>
    %27 = vector.shape_cast %26 : vector<1x1x1xf32> to vector<1x1xf32>
    %28 = vector.shape_cast %25 : vector<1x1xf32> to vector<1x1x1xf32>
    tpu.vector_store %arg6[%c0_16, %c0_17, %c0_18], %28 {strides = array<i32>} : memref<1x1x1xf32, #tpu.memory_space<vmem>>, vector<1x1x1xf32>,
    return
  }
  func.func @transform_0(%arg0: i32) -> (i32, i32) {
    %c0_i32 = arith.constant 0 : i32
    %c0_i32_0 = arith.constant 0 : i32
    return %arg0, %c0_i32 : i32, i32
  }
  func.func @transform_1(%arg0: i32) -> (i32, i32) {
    %c0_i32 = arith.constant 0 : i32
    %c0_i32_0 = arith.constant 0 : i32
    %c0_i32_1 = arith.constant 0 : i32
    return %c0_i32, %c0_i32_0 : i32, i32
  }
  func.func @transform_2(%arg0: i32) -> (i32, i32) {
    %c0_i32 = arith.constant 0 : i32
    %c0_i32_0 = arith.constant 0 : i32
    %c0_i32_1 = arith.constant 0 : i32
    return %c0_i32, %c0_i32_0 : i32, i32
  }
  func.func @transform_3(%arg0: i32) -> (i32, i32) {
    %c0_i32 = arith.constant 0 : i32
    %c0_i32_0 = arith.constant 0 : i32
    %c0_i32_1 = arith.constant 0 : i32
    return %c0_i32, %c0_i32_0 : i32, i32
  }
  func.func @transform_4(%arg0: i32) -> (i32, i32, i32) {
    %c0_i32 = arith.constant 0 : i32
    %c0_i32_0 = arith.constant 0 : i32
    %c0_i32_1 = arith.constant 0 : i32
    return %arg0, %c0_i32, %c0_i32_0 : i32, i32, i32
  }
  func.func @transform_5(%arg0: i32) -> (i32, i32, i32) {
    %c0_i32 = arith.constant 0 : i32
    %c0_i32_0 = arith.constant 0 : i32
    %c0_i32_1 = arith.constant 0 : i32
    return %arg0, %c0_i32, %c0_i32_0 : i32, i32, i32
  }
}

</mosaic_0001>

<bundles_post_ra>
// kernel: _rbm_forward_impl.1
= control target key start
LH: loop header
LB: loop body
LE: loop exit
PB: predicated region body
PF: predicated region fallthrough
CT: control target
= control target key end

     0   :  { %11 = vsyncpa [#allocation3], 0  ;;  %v750_v1 = vmov 0.0   ;;  %vm751_vm0 = vmmov 0   ;;  %vm33_vm1 = vcmask 523264   ;;  %v752_v5 = vmov 0   ;;  %s844_s0 = inlined_call_operand.vmem [shape: f32[8,64], index: 0, kind: input, shape index: {}]   ;;  %s845_s1 = inlined_call_operand.vmem [shape: f32[1,64], index: 1, kind: input, shape index: {}]   ;;  %s846_s2 = inlined_call_operand.vmem [shape: bf16[64,128], index: 2, kind: input, shape index: {}]   ;;  %s847_s3 = inlined_call_operand.vmem [shape: f32[1,128], index: 3, kind: input, shape index: {}]   ;;  %s848_s4 = inlined_call_operand.hbm [shape: f32[1,1,8], index: 4, kind: output, shape index: {0}]   ;;  %s849_s5 = inlined_call_operand.hbm [shape: f32[1,1,1], index: 5, kind: output, shape index: {1}]  }
   0x1   :  { %v696_v0 = vld [vmem:[%s846_s2] sm:$0xff]   ;;  %668 = vmatprep.subr.bf16.mxu1 %v750_v1  ;;  %638 = vmatprep.subr.mxu0 %v750_v1  ;;  %v697_v2 = vld [vmem:[%s846_s2 + $0x8] sm:$0xff]   ;;  %v35_v6 = vsel %vm33_vm1, 1.0, %v752_v5 }
   0x2   :  { %669 = vmatpush3.bf16.msra.mxu1 %v696_v0  ;;  %676 = vmatprep.mubr.msk.bf16.mxu1 %vm751_vm0, %v750_v1  ;;  %v22_v3 = vld [vmem:[%s844_s0] sm:$0xff]  ;;  %v107_v8 = vsub.f32 %v35_v6, %v35_v6 }
   0x3   :  { %670 = vmatprep.subr.bf16.mxu1 %v750_v1  ;;  %640 = vmatprep.mubr.msk.f32.mxu0 %vm751_vm0, %v750_v1  ;;  %v611_v4 = vld [vmem:[%s845_s1] ss:$0 sm:$0xff]  ;;  %v24_v7 = vmul.f32 0.5, %v22_v3 }
   0x4   :  { %12 = vsyncpa [#allocation5], 0  ;;  %v698_v9 = vld [vmem:[%s846_s2 + $0x10] sm:$0xff]   ;;  %v108_v11 = vand.u32 4294901760, %v107_v8  ;;  %v699_v14 = vld [vmem:[%s846_s2 + $0x18] sm:$0xff]   ;;  %v488_v17 = vpack.c.bf16 %v22_v3, %v22_v3  ;;  %v753_v23 = vmov 1.0  }
   0x5   :  { %v31_v10 = vsub.f32 %v611_v4, %v24_v7  ;;  %v615_v24 = vld [vmem:[%s847_s3] ss:$0 sm:$0xff]  ;;  %s754_s29 = smov [#allocation2]   ;;  %vm486_vm2 = vcmask 57344  }
   0x6   :  { %671 = vmatpush3.bf16.msra.mxu1 %v697_v2  ;;  %v109_v13 = vsub.f32 %v107_v8, %v108_v11  ;;  %s589_s30 = sshll.u32 %s754_s29, 4  ;;  %s590_s30 = int_to_ptr.vmem [resolvable:$true] %s589_s30 }
   0x7   :  { %672 = vmatprep.subr.bf16.mxu1 %v750_v1  ;;  %v32_v12 = vmul.f32 %v31_v10, %v22_v3  ;;  %s702_s6 = scalar_lea.vmem %s590_s30, 16  ;;  %s706_s7 = scalar_lea.vmem %s590_s30, 32 }
   0x8   :  { %v110_v18 = vand.u32 4294901760, %v109_v13  ;;  %p703_p0 = scmp.ne.s32.totalorder %s590_s30, %s702_s6  ;;  %p707_p1 = scmp.lt.s32.totalorder %s590_s30, %s590_s30 }
   0x9   :  { %v38_v15 = vsel %vm33_vm1, %v32_v12, 0  ;;  %p708_p2 = scmp.lt.s32.totalorder %s706_s7, %s702_s6 }
   0xa   :  { %673 = vmatpush3.bf16.msra.mxu1 %v698_v9  ;;  %v41_v16 = vand.u32 4294901760, %v38_v15 }
   0xb   :  { %674 = vmatprep.subr.bf16.mxu1 %v750_v1  ;;  %p709_p3 = por %p708_p2, %p707_p1 }
   0xc   :  { %639 = vmatpush3.xpose.msra.mxu0 %v41_v16  ;;  %v118_v19 = vsub.f32 %v38_v15, %v41_v16 }
   0xd   :  { %643 = vmatprep.subr.mxu0 %v750_v1  ;;  %p710_p4 = pnand %p709_p3, %p703_p0 }
   0xe   :  { %675 = vmatpush3.bf16.msra.mxu1 %v699_v14  ;;  %v119_v20 = vand.u32 4294901760, %v118_v19 }
   0xf   :  { %641 = vmatmul.mubr.f32.vlgmr.msra.gmra.mrb[0].mxu0 %v110_v18 }
  0x10   :  { %v120_v21 = vsub.f32 %v118_v19, %v119_v20  ;;  %645 = vmatprep.mubr.msk.f32.mxu0 %vm751_vm0, %v750_v1 }
  0x11   :  { %677 = vmatmul.mubr.msk.bf16.vlgmr.msra.gmra.mrb[0].mxu1 %vm33_vm1, %v488_v17 }
  0x12   :  { %v121_v22 = vand.u32 4294901760, %v120_v21 }
  0x14   :  { %644 = vmatpush3.xpose.msra.mxu0 %v121_v22 }
  0x15   :  { %648 = vmatprep.subr.mxu0 %v750_v1 }
  0x17   :  { %646 = vmatmul.mubr.msk.f32.vlgmr.msra.gmra.mrb[0].mxu0 %vm33_vm1, %v753_v23 }
  0x18   :  { %649 = vmatpush3.xpose.msra.mxu0 %v118_v19  ;;  %650 = vmatprep.mubr.msk.f32.mxu0 %vm751_vm0, %v750_v1 }
  0x19   :  { %653 = vmatprep.subr.mxu0 %v750_v1 }
  0x1f   :  { %651 = vmatmul.mubr.f32.vlgmr.msra.gmra.mrb[0].mxu0 %v107_v8 }
  0x20   :  { %654 = vmatpush3.xpose.msra.mxu0 %v41_v16  ;;  %655 = vmatprep.mubr.msk.f32.mxu0 %vm751_vm0, %v750_v1 }
  0x21   :  { %658 = vmatprep.subr.mxu0 %v750_v1 }
  0x27   :  { %656 = vmatmul.mubr.f32.vlgmr.msra.gmra.mrb[0].mxu0 %v108_v11 }
  0x28   :  { %659 = vmatpush3.xpose.msra.mxu0 %v119_v20  ;;  %660 = vmatprep.mubr.msk.f32.mxu0 %vm751_vm0, %v750_v1 }
  0x29   :  { %663 = vmatprep.subr.mxu0 %v750_v1 }
  0x2f   :  { %661 = vmatmul.mubr.msk.f32.vlgmr.msra.gmra.mrb[0].mxu0 %vm33_vm1, %v753_v23 }
  0x30   :  { %664 = vmatpush3.xpose.msra.mxu0 %v41_v16  ;;  %665 = vmatprep.mubr.msk.f32.mxu0 %vm751_vm0, %v750_v1 }
  0x37   :  { %666 = vmatmul.mubr.msk.f32.vlgmr.msra.gmra.mrb[0].mxu0 %vm33_vm1, %v753_v23 }
  0xe4   :  { %v565_v25 = vpop.f32.mrb[0].mxu1 }
  0xe5   :  { %v566_v26 = vadd.f32 %v615_v24, %v565_v25  ;;  %v678_v27 = vpop.f32.mrb[1].mxu1 }
  0xe6   :  { %v568_v28 = vpop.f32.mrb[2].mxu1 }
  0xe7   :  { %700 = vtanh.f32 %v566_v26  ;;  %v679_v29 = vpop.f32.mrb[3].mxu1 }
  0xf1   :  { %v701_v30 = vpop.eup %700 }
  0xf2   :  { %572 = vadd.xlane.f32.xlu0 %v701_v30 }
 0x10a   :  { %v482_v31 = vpop.f32.mrb[0].mxu0 }
 0x10b   :  { %v667_v32 = vpop.f32.mrb[1].mxu0  ;;  %487 = vst.msk [vmem:[#allocation2] sm:$0x1] %vm486_vm2, %v482_v31 }
 0x10c   :  { %713 = shalt.err (!%p710_p4)
}
 0x10d   :  { %s714_s9 = scalar_lea.hbm %s848_s4, 16 }
 0x10e   :  { %p715_p5 = scmp.ne.s32.totalorder %s848_s4, %s714_s9  ;;  %p718_p6 = scmp.lt.u32.totalorder %s714_s9, %s848_s4 }
 0x110   :  { %p720_p7 = pnand %p718_p6, %p715_p5 }
 0x112   :  { %723 = shalt.err (!%p720_p7)
}
 0x113   :  { %592 = dma.vmem_to_hbm [thread:$0]  %s590_s30, 16, %s848_s4, [#allocation3]   ;;  %vm581_vm3 = vcmask 0  }
 0x114   :  { %s755_s16 = smov [#allocation4]  }
 0x115   :  { %s599_s17 = sshll.u32 %s755_s16, 4  ;;  %s600_s17 = int_to_ptr.vmem [resolvable:$true] %s599_s17 }
 0x116   :  { %s724_s18 = scalar_lea.vmem %s600_s17, 16  ;;  %s728_s19 = scalar_lea.vmem %s600_s17, 32 }
 0x117   :  { %p725_p8 = scmp.ne.s32.totalorder %s600_s17, %s724_s18  ;;  %p729_p9 = scmp.lt.s32.totalorder %s600_s17, %s600_s17 }
 0x118   :  { %p730_p10 = scmp.lt.s32.totalorder %s728_s19, %s724_s18 }
 0x11a   :  { %p731_p11 = por %p730_p10, %p729_p9 }
 0x11c   :  { %p732_p12 = pnand %p731_p11, %p725_p8 }
 0x17f   :  { %v573_v33 = vpop.xlane.xlu0 %572 }
 0x180   :  { %v574_v34 = vrot.slane %v573_v33, 4 }
 0x182   :  { %v575_v35 = vadd.f32 %v574_v34, %v573_v33 }
 0x184   :  { %v576_v36 = vrot.slane %v575_v35, 2 }
 0x186   :  { %v577_v37 = vadd.f32 %v576_v36, %v575_v35 }
 0x188   :  { %v578_v38 = vrot.slane %v577_v37, 1 }
 0x18a   :  { %v579_v39 = vadd.f32 %v578_v38, %v577_v37 }
 0x18c   :  { %v580_v40 = vsub.f32 0.0, %v579_v39 }
 0x18e   :  { %582 = vst.msk [vmem:[#allocation4] sm:$0x1] %vm581_vm3, %v580_v40 }
 0x18f   :  { %735 = shalt.err (!%p732_p12)
}
 0x190   :  { %s736_s21 = scalar_lea.hbm %s849_s5, 16 }
 0x191   :  { %p737_p13 = scmp.ne.s32.totalorder %s849_s5, %s736_s21  ;;  %p740_p0 = scmp.lt.u32.totalorder %s736_s21, %s849_s5 }
 0x193   :  { %p742_p1 = pnand %p740_p0, %p737_p13 }
 0x195   :  { %745 = shalt.err (!%p742_p1)
}
 0x196   :  { %602 = dma.vmem_to_hbm [thread:$0]  %s600_s17, 16, %s849_s5, [#allocation5]  }
 0x197   :  { %746 = dma.done.wait [#allocation3], 16  }
 0x198   :  { %747 = vsyncadd [#allocation3], 4294967280 }
 0x199   :  { %748 = dma.done.wait [#allocation5], 16  }
 0x19a   :  { %749 = vsyncadd [#allocation5], 4294967280 }
 0x19b   :  { %609 = vsyncpa [#allocation3], 1 }
 0x19c   :  { %610 = vsyncpa [#allocation5], 1 }

</bundles_post_ra>
